<compile_context>
chip_gen: v6e
topology: v6e:2x2x1
jax: 0.10.0
libtpu: 0.0.40
codegen_flags: <defaults>
</compile_context>

<pallas_src>
import jax
import jax.numpy as jnp
import numpy as np
from jax.experimental import pallas as pl
from jax.experimental.pallas import tpu as pltpu

LANE = 128  # TPU lane width; every feature dim is zero-padded to this.


# ---------------------------------------------------------------------------
# Kernel
# ---------------------------------------------------------------------------
def _sage_fused_kernel(*refs):
    """Fused forward over all layers.

    refs = (features,
            a_0, hbar_0, agg_0, w1_0, w2_0, b_0,
            a_1, hbar_1, agg_1, w1_1, w2_1, b_1,
            ...,
            out)
    a_l    : (n_dst_l, n_src_l) bf16  row-normalized block adjacency (mean aggregation)
    hbar_l : (n_src_l, LANE)    f32   historical activations
    agg_l  : (n_dst_l, LANE)    f32   aggregated historical activations
    w1_l   : (LANE, LANE)       bf16  weight rows acting on H_dst
    w2_l   : (LANE, LANE)       bf16  weight rows acting on h_neigh
    b_l    : (1, LANE)          f32
    """
    feat_ref, o_ref = refs[0], refs[-1]
    layer_refs = refs[1:-1]
    n_layers = len(layer_refs) // 6

    h = feat_ref[...]  # (n_src_0, LANE) f32, stays resident in vregs/VMEM for the whole forward
    for l in range(n_layers):
        a_ref, hbar_ref, agg_ref, w1_ref, w2_ref, b_ref = layer_refs[6 * l: 6 * l + 6]
        n_dst = a_ref.shape[0]

        # control-variate delta: keep in f32 on the VPU for significance
        hdelta = h - hbar_ref[...]

        # mean aggregation over in-neighbors: A_mean @ hdelta (bf16 MXU, f32 accumulate)
        hdelta_new = jnp.dot(a_ref[...], hdelta.astype(jnp.bfloat16),
                             preferred_element_type=jnp.float32)
        h_neigh = agg_ref[...] + hdelta_new

        # Linear(cat([H_dst, h_neigh])) as two independent matmuls (no lane-concat copy).
        h_self = jnp.dot(h[:n_dst].astype(jnp.bfloat16), w1_ref[...],
                         preferred_element_type=jnp.float32)
        h_nb = jnp.dot(h_neigh.astype(jnp.bfloat16), w2_ref[...],
                       preferred_element_type=jnp.float32)
        h = h_self + h_nb + b_ref[...]

        if l < n_layers - 1:          # last layer has activation=None
            h = jnp.maximum(h, 0.0)

    o_ref[...] = h.astype(o_ref.dtype)


# ---------------------------------------------------------------------------
# Wrapper
# ---------------------------------------------------------------------------
def sage_forward_pallas(params_pad, blocks_bf16, features_pad, hists_pad,
                        aggs_pad, n_classes):
    """Runs the whole SAGE forward as one pallas_call. Returns (n_dst_last, n_classes)."""
    n_layers = len(params_pad)
    operands = [features_pad]
    for l in range(n_layers):
        w1_pad, w2_pad, b_pad = params_pad[l]
        operands += [blocks_bf16[l], hists_pad[l], aggs_pad[l], w1_pad, w2_pad, b_pad]

    n_dst_last = blocks_bf16[-1].shape[0]

    # Advisory cost estimate so XLA can overlap the custom call with surrounding ops.
    flops = 0
    for a in blocks_bf16:
        n_dst, n_src = a.shape
        flops += 2 * n_dst * n_src * LANE          # aggregation matmul
        flops += 2 * n_dst * (2 * LANE) * LANE     # output linear (two matmuls)
    bytes_accessed = sum(int(x.size) * x.dtype.itemsize for x in operands)
    bytes_accessed += n_dst_last * LANE * 4

    vmem_spec = pl.BlockSpec(memory_space=pltpu.MemorySpace.VMEM)
    out = pl.pallas_call(
        _sage_fused_kernel,
        out_shape=jax.ShapeDtypeStruct((n_dst_last, LANE), jnp.float32),
        in_specs=[vmem_spec] * len(operands),
        out_specs=vmem_spec,
        cost_estimate=pl.CostEstimate(flops=flops, transcendentals=0,
                                      bytes_accessed=bytes_accessed),
    )(*operands)
    return out[:, :n_classes]
    # TODO(synk): on v7x a 2-way core split over dst rows (core_map / parallel grid axis)
    # would use both TensorCores, but at these tiny shapes the cross-core re-gather of h
    # between layers would dominate, so the fused single-core kernel is kept.


# ---------------------------------------------------------------------------
# Test-data construction helpers
# ---------------------------------------------------------------------------
def xavier_uniform_relu(key, out_feats, in_feats):
    """nn.init.xavier_uniform_ with gain=calculate_gain('relu')=sqrt(2)."""
    gain = float(np.sqrt(2.0))
    bound = gain * float(np.sqrt(6.0 / (in_feats + out_feats)))
    return jax.random.uniform(key, (out_feats, in_feats), jnp.float32,
                              minval=-bound, maxval=bound)


def make_block_adjacency(key, n_dst, n_src):
    """Random block: dst nodes are a prefix of src nodes; mean-normalized rows."""
    mask = jax.random.bernoulli(key, p=0.5, shape=(n_dst, n_src)).astype(jnp.float32)
    eye = jnp.eye(n_dst, n_src, dtype=jnp.float32)   # self-edge so every row has a neighbor
    adj = jnp.maximum(mask, eye)
    deg = jnp.sum(adj, axis=1, keepdims=True)
    return adj / deg


def _pad_last(x, target):
    pad = target - x.shape[-1]
    if pad <= 0:
        return x
    widths = [(0, 0)] * (x.ndim - 1) + [(0, pad)]
    return jnp.pad(x, widths)


def sage_forward_reference(params, blocks, features, hists, agg_hists):
    """Pure-JAX reference with identical numerics (bf16 MXU operands, f32 accumulate)."""
    h = features
    n_layers = len(params)
    for l, ((wt, b), a) in enumerate(zip(params, blocks)):
        n_dst, _ = a.shape
        f_in = hists[l].shape[-1]
        hdelta = h - hists[l]
        hdelta_new = jnp.dot(a.astype(jnp.bfloat16), hdelta.astype(jnp.bfloat16),
                             preferred_element_type=jnp.float32)
        h_neigh = agg_hists[l] + hdelta_new
        w1 = wt[:f_in].astype(jnp.bfloat16)      # rows acting on H_dst
        w2 = wt[f_in:].astype(jnp.bfloat16)      # rows acting on h_neigh
        out = (jnp.dot(h[:n_dst].astype(jnp.bfloat16), w1,
                       preferred_element_type=jnp.float32)
               + jnp.dot(h_neigh.astype(jnp.bfloat16), w2,
                         preferred_element_type=jnp.float32)
               + b[None, :])
        if l < n_layers - 1:
            out = jnp.maximum(out, 0.0)
        h = out
    return h


# ---------------------------------------------------------------------------
# Main
# ---------------------------------------------------------------------------
if __name__ == "__main__":
    key = jax.random.PRNGKey(0)

    # Small model config consistent with SAGE.__init__: 3 layers
    in_feats, n_hidden, n_classes, n_layers = 16, 32, 8, 3
    feat_dims = [in_feats] + [n_hidden] * (n_layers - 1)
    out_dims = [n_hidden] * (n_layers - 1) + [n_classes]

    # Block sizes (dst nodes are a prefix of src nodes; chained across layers)
    src_sizes = [64, 32, 16]
    dst_sizes = [32, 16, 8]

    # Parameters: W of shape (out, 2*in); transposed to (2*in, out) for right-matmul.
    params_ref, params_pad = [], []
    for l in range(n_layers):
        key, wk = jax.random.split(key)
        W = xavier_uniform_relu(wk, out_dims[l], 2 * feat_dims[l])   # (out, 2*in)
        Wt = W.T                                                     # (2*in, out)
        b = jnp.zeros((out_dims[l],), jnp.float32)
        params_ref.append((Wt, b))
        # Split + pad: w1 acts on H_dst features, w2 on h_neigh features.
        w1_pad = jnp.zeros((LANE, LANE), jnp.float32)
        w1_pad = w1_pad.at[:feat_dims[l], :out_dims[l]].set(Wt[:feat_dims[l]])
        w2_pad = jnp.zeros((LANE, LANE), jnp.float32)
        w2_pad = w2_pad.at[:feat_dims[l], :out_dims[l]].set(Wt[feat_dims[l]:])
        b_pad = jnp.zeros((1, LANE), jnp.float32).at[0, :out_dims[l]].set(b)
        params_pad.append((w1_pad.astype(jnp.bfloat16),
                           w2_pad.astype(jnp.bfloat16), b_pad))

    # Blocks (dense row-normalized adjacency), historical + aggregated historical activations.
    # TODO(synk): DGL's sparse block message passing (copy_u + mean over edge lists) is
    # represented here as a dense row-normalized adjacency matmul.
    blocks, hists, aggs = [], [], []
    for l in range(n_layers):
        key, ak, hk, gk = jax.random.split(key, 4)
        blocks.append(make_block_adjacency(ak, dst_sizes[l], src_sizes[l]))
        hists.append(jax.random.normal(hk, (src_sizes[l], feat_dims[l]), jnp.float32))
        aggs.append(jax.random.normal(gk, (dst_sizes[l], feat_dims[l]), jnp.float32))

    key, fk = jax.random.split(key)
    features = jax.random.normal(fk, (src_sizes[0], in_feats), jnp.float32)

    # Padded / bf16 operands for the fused kernel.
    blocks_bf16 = [a.astype(jnp.bfloat16) for a in blocks]
    hists_pad = [_pad_last(x, LANE) for x in hists]
    aggs_pad = [_pad_last(x, LANE) for x in aggs]
    features_pad = _pad_last(features, LANE)

    out = sage_forward_pallas(params_pad, blocks_bf16, features_pad, hists_pad,
                              aggs_pad, n_classes)
    out = jax.block_until_ready(out)

    ref = sage_forward_reference(params_ref, blocks, features, hists, aggs)
    np.testing.assert_allclose(np.asarray(out), np.asarray(ref), rtol=1e-3, atol=1e-3)
    assert out.shape == (dst_sizes[-1], n_classes)

    print("KERNEL_OK")
</pallas_src>

<mosaic_0001>
module attributes {stable_mosaic.version = 11 : i64} {
  func.func @_sage_fused_kernel(%arg0: memref<64x128xf32, #tpu.memory_space<vmem>>, %arg1: memref<32x64xbf16, #tpu.memory_space<vmem>>, %arg2: memref<64x128xf32, #tpu.memory_space<vmem>>, %arg3: memref<32x128xf32, #tpu.memory_space<vmem>>, %arg4: memref<128x128xbf16, #tpu.memory_space<vmem>>, %arg5: memref<128x128xbf16, #tpu.memory_space<vmem>>, %arg6: memref<1x128xf32, #tpu.memory_space<vmem>>, %arg7: memref<16x32xbf16, #tpu.memory_space<vmem>>, %arg8: memref<32x128xf32, #tpu.memory_space<vmem>>, %arg9: memref<16x128xf32, #tpu.memory_space<vmem>>, %arg10: memref<128x128xbf16, #tpu.memory_space<vmem>>, %arg11: memref<128x128xbf16, #tpu.memory_space<vmem>>, %arg12: memref<1x128xf32, #tpu.memory_space<vmem>>, %arg13: memref<8x16xbf16, #tpu.memory_space<vmem>>, %arg14: memref<16x128xf32, #tpu.memory_space<vmem>>, %arg15: memref<8x128xf32, #tpu.memory_space<vmem>>, %arg16: memref<128x128xbf16, #tpu.memory_space<vmem>>, %arg17: memref<128x128xbf16, #tpu.memory_space<vmem>>, %arg18: memref<1x128xf32, #tpu.memory_space<vmem>>, %arg19: memref<8x128xf32, #tpu.memory_space<vmem>>) attributes {dimension_semantics = [], scalar_prefetch = 0 : i64, scratch_operands = 0 : i64, tpu.core_type = #tpu.core_type<tc>} {
    %c0 = arith.constant 0 : index
    %c0_0 = arith.constant 0 : index
    %0 = vector.load %arg0[%c0, %c0_0] : memref<64x128xf32, #tpu.memory_space<vmem>>, vector<64x128xf32>
    %c0_1 = arith.constant 0 : index
    %c0_2 = arith.constant 0 : index
    %1 = vector.load %arg2[%c0_1, %c0_2] : memref<64x128xf32, #tpu.memory_space<vmem>>, vector<64x128xf32>
    %2 = arith.subf %0, %1 : vector<64x128xf32>
    %c0_3 = arith.constant 0 : index
    %c0_4 = arith.constant 0 : index
    %3 = vector.load %arg1[%c0_3, %c0_4] : memref<32x64xbf16, #tpu.memory_space<vmem>>, vector<32x64xbf16>
    %4 = arith.truncf %2 : vector<64x128xf32> to vector<64x128xbf16>
    %cst = arith.constant dense<0.000000e+00> : vector<32x128xf32>
    %5 = tpu.matmul %3, %4, %cst {dimension_numbers = #tpu.dot_dimension_numbers<[1], [0], [0], [1], [0, 0, 1, 1], [], []>} : vector<32x64xbf16>, vector<64x128xbf16>, vector<32x128xf32> -> vector<32x128xf32>
    %c0_5 = arith.constant 0 : index
    %c0_6 = arith.constant 0 : index
    %6 = vector.load %arg3[%c0_5, %c0_6] : memref<32x128xf32, #tpu.memory_space<vmem>>, vector<32x128xf32>
    %7 = arith.addf %6, %5 : vector<32x128xf32>
    %8 = vector.extract_strided_slice %0 {offsets = [0, 0], sizes = [32, 128], strides = [1, 1]} : vector<64x128xf32> to vector<32x128xf32>
    %9 = arith.truncf %8 : vector<32x128xf32> to vector<32x128xbf16>
    %c0_7 = arith.constant 0 : index
    %c0_8 = arith.constant 0 : index
    %10 = vector.load %arg4[%c0_7, %c0_8] : memref<128x128xbf16, #tpu.memory_space<vmem>>, vector<128x128xbf16>
    %cst_9 = arith.constant dense<0.000000e+00> : vector<32x128xf32>
    %11 = tpu.matmul %9, %10, %cst_9 {dimension_numbers = #tpu.dot_dimension_numbers<[1], [0], [0], [1], [0, 0, 1, 1], [], []>} : vector<32x128xbf16>, vector<128x128xbf16>, vector<32x128xf32> -> vector<32x128xf32>
    %12 = arith.truncf %7 : vector<32x128xf32> to vector<32x128xbf16>
    %c0_10 = arith.constant 0 : index
    %c0_11 = arith.constant 0 : index
    %13 = vector.load %arg5[%c0_10, %c0_11] : memref<128x128xbf16, #tpu.memory_space<vmem>>, vector<128x128xbf16>
    %cst_12 = arith.constant dense<0.000000e+00> : vector<32x128xf32>
    %14 = tpu.matmul %12, %13, %cst_12 {dimension_numbers = #tpu.dot_dimension_numbers<[1], [0], [0], [1], [0, 0, 1, 1], [], []>} : vector<32x128xbf16>, vector<128x128xbf16>, vector<32x128xf32> -> vector<32x128xf32>
    %15 = arith.addf %11, %14 : vector<32x128xf32>
    %c0_13 = arith.constant 0 : index
    %c0_14 = arith.constant 0 : index
    %16 = vector.load %arg6[%c0_13, %c0_14] : memref<1x128xf32, #tpu.memory_space<vmem>>, vector<1x128xf32>
    %17 = vector.broadcast %16 : vector<1x128xf32> to vector<32x128xf32>
    %18 = arith.addf %15, %17 : vector<32x128xf32>
    %cst_15 = arith.constant 0.000000e+00 : f32
    %19 = vector.broadcast %cst_15 : f32 to vector<32x128xf32>
    %20 = arith.maximumf %18, %19 : vector<32x128xf32>
    %c0_16 = arith.constant 0 : index
    %c0_17 = arith.constant 0 : index
    %21 = vector.load %arg8[%c0_16, %c0_17] : memref<32x128xf32, #tpu.memory_space<vmem>>, vector<32x128xf32>
    %22 = arith.subf %20, %21 : vector<32x128xf32>
    %c0_18 = arith.constant 0 : index
    %c0_19 = arith.constant 0 : index
    %23 = vector.load %arg7[%c0_18, %c0_19] : memref<16x32xbf16, #tpu.memory_space<vmem>>, vector<16x32xbf16>
    %24 = arith.truncf %22 : vector<32x128xf32> to vector<32x128xbf16>
    %cst_20 = arith.constant dense<0.000000e+00> : vector<16x128xf32>
    %25 = tpu.matmul %23, %24, %cst_20 {dimension_numbers = #tpu.dot_dimension_numbers<[1], [0], [0], [1], [0, 0, 1, 1], [], []>} : vector<16x32xbf16>, vector<32x128xbf16>, vector<16x128xf32> -> vector<16x128xf32>
    %c0_21 = arith.constant 0 : index
    %c0_22 = arith.constant 0 : index
    %26 = vector.load %arg9[%c0_21, %c0_22] : memref<16x128xf32, #tpu.memory_space<vmem>>, vector<16x128xf32>
    %27 = arith.addf %26, %25 : vector<16x128xf32>
    %28 = vector.extract_strided_slice %20 {offsets = [0, 0], sizes = [16, 128], strides = [1, 1]} : vector<32x128xf32> to vector<16x128xf32>
    %29 = arith.truncf %28 : vector<16x128xf32> to vector<16x128xbf16>
    %c0_23 = arith.constant 0 : index
    %c0_24 = arith.constant 0 : index
    %30 = vector.load %arg10[%c0_23, %c0_24] : memref<128x128xbf16, #tpu.memory_space<vmem>>, vector<128x128xbf16>
    %cst_25 = arith.constant dense<0.000000e+00> : vector<16x128xf32>
    %31 = tpu.matmul %29, %30, %cst_25 {dimension_numbers = #tpu.dot_dimension_numbers<[1], [0], [0], [1], [0, 0, 1, 1], [], []>} : vector<16x128xbf16>, vector<128x128xbf16>, vector<16x128xf32> -> vector<16x128xf32>
    %32 = arith.truncf %27 : vector<16x128xf32> to vector<16x128xbf16>
    %c0_26 = arith.constant 0 : index
    %c0_27 = arith.constant 0 : index
    %33 = vector.load %arg11[%c0_26, %c0_27] : memref<128x128xbf16, #tpu.memory_space<vmem>>, vector<128x128xbf16>
    %cst_28 = arith.constant dense<0.000000e+00> : vector<16x128xf32>
    %34 = tpu.matmul %32, %33, %cst_28 {dimension_numbers = #tpu.dot_dimension_numbers<[1], [0], [0], [1], [0, 0, 1, 1], [], []>} : vector<16x128xbf16>, vector<128x128xbf16>, vector<16x128xf32> -> vector<16x128xf32>
    %35 = arith.addf %31, %34 : vector<16x128xf32>
    %c0_29 = arith.constant 0 : index
    %c0_30 = arith.constant 0 : index
    %36 = vector.load %arg12[%c0_29, %c0_30] : memref<1x128xf32, #tpu.memory_space<vmem>>, vector<1x128xf32>
    %37 = vector.broadcast %36 : vector<1x128xf32> to vector<16x128xf32>
    %38 = arith.addf %35, %37 : vector<16x128xf32>
    %cst_31 = arith.constant 0.000000e+00 : f32
    %39 = vector.broadcast %cst_31 : f32 to vector<16x128xf32>
    %40 = arith.maximumf %38, %39 : vector<16x128xf32>
    %c0_32 = arith.constant 0 : index
    %c0_33 = arith.constant 0 : index
    %41 = vector.load %arg14[%c0_32, %c0_33] : memref<16x128xf32, #tpu.memory_space<vmem>>, vector<16x128xf32>
    %42 = arith.subf %40, %41 : vector<16x128xf32>
    %c0_34 = arith.constant 0 : index
    %c0_35 = arith.constant 0 : index
    %43 = vector.load %arg13[%c0_34, %c0_35] : memref<8x16xbf16, #tpu.memory_space<vmem>>, vector<8x16xbf16>
    %44 = arith.truncf %42 : vector<16x128xf32> to vector<16x128xbf16>
    %cst_36 = arith.constant dense<0.000000e+00> : vector<8x128xf32>
    %45 = tpu.matmul %43, %44, %cst_36 {dimension_numbers = #tpu.dot_dimension_numbers<[1], [0], [0], [1], [0, 0, 1, 1], [], []>} : vector<8x16xbf16>, vector<16x128xbf16>, vector<8x128xf32> -> vector<8x128xf32>
    %c0_37 = arith.constant 0 : index
    %c0_38 = arith.constant 0 : index
    %46 = vector.load %arg15[%c0_37, %c0_38] : memref<8x128xf32, #tpu.memory_space<vmem>>, vector<8x128xf32>
    %47 = arith.addf %46, %45 : vector<8x128xf32>
    %48 = vector.extract_strided_slice %40 {offsets = [0, 0], sizes = [8, 128], strides = [1, 1]} : vector<16x128xf32> to vector<8x128xf32>
    %49 = arith.truncf %48 : vector<8x128xf32> to vector<8x128xbf16>
    %c0_39 = arith.constant 0 : index
    %c0_40 = arith.constant 0 : index
    %50 = vector.load %arg16[%c0_39, %c0_40] : memref<128x128xbf16, #tpu.memory_space<vmem>>, vector<128x128xbf16>
    %cst_41 = arith.constant dense<0.000000e+00> : vector<8x128xf32>
    %51 = tpu.matmul %49, %50, %cst_41 {dimension_numbers = #tpu.dot_dimension_numbers<[1], [0], [0], [1], [0, 0, 1, 1], [], []>} : vector<8x128xbf16>, vector<128x128xbf16>, vector<8x128xf32> -> vector<8x128xf32>
    %52 = arith.truncf %47 : vector<8x128xf32> to vector<8x128xbf16>
    %c0_42 = arith.constant 0 : index
    %c0_43 = arith.constant 0 : index
    %53 = vector.load %arg17[%c0_42, %c0_43] : memref<128x128xbf16, #tpu.memory_space<vmem>>, vector<128x128xbf16>
    %cst_44 = arith.constant dense<0.000000e+00> : vector<8x128xf32>
    %54 = tpu.matmul %52, %53, %cst_44 {dimension_numbers = #tpu.dot_dimension_numbers<[1], [0], [0], [1], [0, 0, 1, 1], [], []>} : vector<8x128xbf16>, vector<128x128xbf16>, vector<8x128xf32> -> vector<8x128xf32>
    %55 = arith.addf %51, %54 : vector<8x128xf32>
    %c0_45 = arith.constant 0 : index
    %c0_46 = arith.constant 0 : index
    %56 = vector.load %arg18[%c0_45, %c0_46] : memref<1x128xf32, #tpu.memory_space<vmem>>, vector<1x128xf32>
    %57 = vector.broadcast %56 : vector<1x128xf32> to vector<8x128xf32>
    %58 = arith.addf %55, %57 : vector<8x128xf32>
    %c0_47 = arith.constant 0 : index
    %c0_48 = arith.constant 0 : index
    %59 = vector.load %arg19[%c0_47, %c0_48] : memref<8x128xf32, #tpu.memory_space<vmem>>, vector<8x128xf32>
    tpu.vector_store %arg19[%c0_47, %c0_48], %58 {strides = array<i32>} : memref<8x128xf32, #tpu.memory_space<vmem>>, vector<8x128xf32>,
    return
  }
}

</mosaic_0001>

<bundles_post_ra>
// kernel: tpu_custom_call.1
= control target key start
LH: loop header
LB: loop body
LE: loop exit
PB: predicated region body
PF: predicated region fallthrough
CT: control target
= control target key end

     0   :  { %s2167_s0 = inlined_call_operand.hbm [shape: f32[64,128], index: 0, kind: input, shape index: {}]   ;;  %s2168_s1 = inlined_call_operand.hbm [shape: bf16[32,64], index: 1, kind: input, shape index: {}]   ;;  %s2169_s2 = inlined_call_operand.hbm [shape: f32[64,128], index: 2, kind: input, shape index: {}]   ;;  %s2170_s3 = inlined_call_operand.hbm [shape: f32[32,128], index: 3, kind: input, shape index: {}]   ;;  %s2171_s4 = inlined_call_operand.hbm [shape: bf16[128,128], index: 4, kind: input, shape index: {}]   ;;  %s2172_s5 = inlined_call_operand.hbm [shape: bf16[128,128], index: 5, kind: input, shape index: {}]   ;;  %s2173_s6 = inlined_call_operand.hbm [shape: f32[1,128], index: 6, kind: input, shape index: {}]   ;;  %s2174_s7 = inlined_call_operand.hbm [shape: bf16[16,32], index: 7, kind: input, shape index: {}]   ;;  %s2175_s8 = inlined_call_operand.hbm [shape: f32[32,128], index: 8, kind: input, shape index: {}]   ;;  %s2176_s9 = inlined_call_operand.vmem [shape: f32[16,128], index: 9, kind: input, shape index: {}]   ;;  %s2177_s10 = inlined_call_operand.hbm [shape: bf16[128,128], index: 10, kind: input, shape index: {}]   ;;  %s2178_s11 = inlined_call_operand.hbm [shape: bf16[128,128], index: 11, kind: input, shape index: {}]   ;;  %s2179_s12 = inlined_call_operand.vmem [shape: f32[1,128], index: 12, kind: input, shape index: {}]   ;;  %s2180_s13 = inlined_call_operand.hbm [shape: bf16[8,16], index: 13, kind: input, shape index: {}]   ;;  %s2181_s14 = inlined_call_operand.hbm [shape: f32[16,128], index: 14, kind: input, shape index: {}]   ;;  %s2182_s15 = inlined_call_operand.vmem [shape: f32[8,128], index: 15, kind: input, shape index: {}]   ;;  %s2183_s16 = inlined_call_operand.hbm [shape: bf16[128,128], index: 16, kind: input, shape index: {}]   ;;  %s2184_s17 = inlined_call_operand.hbm [shape: bf16[128,128], index: 17, kind: input, shape index: {}]   ;;  %s2185_s18 = inlined_call_operand.vmem [shape: f32[1,128], index: 18, kind: input, shape index: {}]   ;;  %s2186_s19 = inlined_call_operand.hbm [shape: f32[8,128], index: 19, kind: output, shape index: {}]  }
   0x1   :  { %2187 = sst [smem:[#allocation36_spill]] %s2167_s0 }
   0x2   :  { %2188 = sst [smem:[#allocation37_spill]] %s2168_s1 }
   0x3   :  { %2189 = sst [smem:[#allocation38_spill]] %s2169_s2 }
   0x4   :  { %2190 = sst [smem:[#allocation39_spill]] %s2170_s3 }
   0x5   :  { %24 = vsyncpa [#allocation3], 0 }
   0x6   :  { %25 = vsyncpa [#allocation6], 0 }
   0x7   :  { %26 = vsyncpa [#allocation9], 0 }
   0x8   :  { %27 = vsyncpa [#allocation12], 0 }
   0x9   :  { %28 = vsyncpa [#allocation15], 0 }
   0xa   :  { %29 = vsyncpa [#allocation18], 0 }
   0xb   :  { %30 = vsyncpa [#allocation21], 0 }
   0xc   :  { %31 = vsyncpa [#allocation24], 0 }
   0xd   :  { %32 = vsyncpa [#allocation4], 0  ;;  %s1878_s0 = smov [#allocation5]  }
   0xe   :  { %s50_s30 = sshll.u32 %s1878_s0, 4  ;;  %s51_s30 = int_to_ptr.vmem [resolvable:$true] %s50_s30 }
   0xf   :  { %s1548_s20 = scalar_lea.vmem %s51_s30, 256  ;;  %p1553_p1 = scmp.lt.s32.totalorder %s51_s30, %s51_s30 }
  0x10   :  { %p1549_p0 = scmp.ne.s32.totalorder %s51_s30, %s1548_s20  ;;  %p1554_p2 = scmp.lt.s32.totalorder %s1548_s20, %s1548_s20 }
  0x12   :  { %p1555_p3 = por %p1554_p2, %p1553_p1 }
  0x14   :  { %p1556_p4 = pnand %p1555_p3, %p1549_p0 }
  0x16   :  { %1559 = shalt.err (!%p1556_p4)
}
  0x17   :  { %s1879_s21 = smov 64   ;;  %s1880_s1 = smov 4  }
  0x18   :  { %s2191_s23 = sld [smem:[#allocation37_spill]]  ;;  %s1881_s24 = smov [#allocation8]  }
  0x19   :  { %s74_s25 = sshll.u32 %s1881_s24, 4  ;;  %s1882_s3 = smov [#allocation11]   ;;  %s75_s25 = int_to_ptr.vmem [resolvable:$true] %s74_s25 }
  0x1a   :  { %s98_s26 = sshll.u32 %s1882_s3, 4  ;;  %s1568_s27 = scalar_lea.vmem %s75_s25, 512  ;;  %s99_s26 = int_to_ptr.vmem [resolvable:$true] %s98_s26 }
  0x1b   :  { %p1569_p5 = scmp.ne.s32.totalorder %s75_s25, %s1568_s27  ;;  %p1573_p6 = scmp.lt.s32.totalorder %s75_s25, %s75_s25 }
  0x1c   :  { %p1574_p7 = scmp.lt.s32.totalorder %s1568_s27, %s1568_s27 }
  0x1e   :  { %56 = dma.hbm_to_vmem [thread:$0]  %s2191_s23, 256, %s51_s30, [#allocation6], %s1879_s21, %s1879_s21, %s1880_s1  }
  0x1f   :  { %p1575_p8 = por %p1574_p7, %p1573_p6 }
  0x21   :  { %p1576_p9 = pnand %p1575_p8, %p1569_p5 }
  0x23   :  { %1579 = shalt.err (!%p1576_p9)
}
  0x24   :  { %s1883_s28 = smov 128   ;;  %s1884_s29 = smov 8  }
  0x25   :  { %s2192_s30 = sld [smem:[#allocation39_spill]]  ;;  %s1588_s22 = scalar_lea.vmem %s99_s26, 1024 }
  0x26   :  { %p1589_p10 = scmp.ne.s32.totalorder %s99_s26, %s1588_s22  ;;  %p1593_p11 = scmp.lt.s32.totalorder %s99_s26, %s99_s26 }
  0x27   :  { %p1594_p12 = scmp.lt.s32.totalorder %s1588_s22, %s1588_s22 }
  0x29   :  { %p1595_p13 = por %p1594_p12, %p1593_p11 }
  0x2b   :  { %80 = dma.hbm_to_vmem [thread:$0]  %s2192_s30, 512, %s75_s25, [#allocation9], %s1883_s28, %s1883_s28, %s1884_s29  }
  0x2c   :  { %p1596_p0 = pnand %p1595_p13, %p1589_p10 }
  0x2e   :  { %1599 = shalt.err (!%p1596_p0)
}
  0x2f   :  { %104 = dma.hbm_to_vmem [thread:$0]  %s2172_s5, 1024, %s99_s26, [#allocation12], %s1879_s21, %s1879_s21, %s1880_s1  }
  0x30   :  { %s1885_s24 = smov [#allocation14]   ;;  %s1886_s27 = smov [#allocation17]  }
  0x31   :  { %s120_s3 = sshll.u32 %s1885_s24, 4  ;;  %s146_s25 = sshll.u32 %s1886_s27, 4  ;;  %s121_s3 = int_to_ptr.vmem [resolvable:$true] %s120_s3  ;;  %s147_s25 = int_to_ptr.vmem [resolvable:$true] %s146_s25 }
  0x32   :  { %s1608_s0 = scalar_lea.vmem %s121_s3, 128  ;;  %p1613_p2 = scmp.lt.s32.totalorder %s121_s3, %s121_s3 }
  0x33   :  { %p1609_p1 = scmp.ne.s32.totalorder %s121_s3, %s1608_s0  ;;  %p1614_p3 = scmp.lt.s32.totalorder %s1608_s0, %s1608_s0 }
  0x35   :  { %p1615_p4 = por %p1614_p3, %p1613_p2 }
  0x37   :  { %p1616_p5 = pnand %p1615_p4, %p1609_p1 }
  0x39   :  { %1619 = shalt.err (!%p1616_p5)
}
  0x3a   :  { %126 = dma.hbm_to_vmem [thread:$0]  %s2174_s7, 128, %s121_s3, [#allocation15], %s1879_s21, %s1879_s21, %s1880_s1  }
  0x3b   :  { %s1628_s5 = scalar_lea.vmem %s147_s25, 1024  ;;  %p1633_p7 = scmp.lt.s32.totalorder %s147_s25, %s147_s25 }
  0x3c   :  { %p1629_p6 = scmp.ne.s32.totalorder %s147_s25, %s1628_s5  ;;  %p1634_p8 = scmp.lt.s32.totalorder %s1628_s5, %s1628_s5 }
  0x3e   :  { %p1635_p9 = por %p1634_p8, %p1633_p7 }
  0x40   :  { %p1636_p10 = pnand %p1635_p9, %p1629_p6 }
  0x42   :  { %1639 = shalt.err (!%p1636_p10)
}
  0x43   :  { %152 = dma.hbm_to_vmem [thread:$0]  %s2177_s10, 1024, %s147_s25, [#allocation18], %s1879_s21, %s1879_s21, %s1880_s1  }
  0x44   :  { %s1887_s2 = smov [#allocation20]   ;;  %s1888_s24 = smov [#allocation23]  }
  0x45   :  { %s173_s23 = sshll.u32 %s1887_s2, 4  ;;  %s196_s7 = sshll.u32 %s1888_s24, 4  ;;  %s174_s23 = int_to_ptr.vmem [resolvable:$true] %s173_s23  ;;  %s197_s7 = int_to_ptr.vmem [resolvable:$true] %s196_s7 }
  0x46   :  { %s1648_s3 = scalar_lea.vmem %s174_s23, 64  ;;  %p1653_p12 = scmp.lt.s32.totalorder %s174_s23, %s174_s23 }
  0x47   :  { %p1649_p11 = scmp.ne.s32.totalorder %s174_s23, %s1648_s3  ;;  %p1654_p13 = scmp.lt.s32.totalorder %s1648_s3, %s1648_s3 }
  0x49   :  { %p1655_p0 = por %p1654_p13, %p1653_p12 }
  0x4b   :  { %p1656_p1 = pnand %p1655_p0, %p1649_p11 }
  0x4d   :  { %1659 = shalt.err (!%p1656_p1)
}
  0x4e   :  { %176 = dma.hbm_to_vmem [thread:$0]  %s2180_s13, 64, %s174_s23, [#allocation21]  }
  0x4f   :  { %s1668_s20 = scalar_lea.vmem %s197_s7, 1024  ;;  %p1673_p3 = scmp.lt.s32.totalorder %s197_s7, %s197_s7 }
  0x50   :  { %p1669_p2 = scmp.ne.s32.totalorder %s197_s7, %s1668_s20  ;;  %p1674_p4 = scmp.lt.s32.totalorder %s1668_s20, %s1668_s20 }
  0x52   :  { %p1675_p5 = por %p1674_p4, %p1673_p3 }
  0x54   :  { %p1676_p6 = pnand %p1675_p5, %p1669_p2 }
  0x56   :  { %1679 = shalt.err (!%p1676_p6)
}
  0x57   :  { %202 = dma.hbm_to_vmem [thread:$0]  %s2183_s16, 1024, %s197_s7, [#allocation24], %s1879_s21, %s1879_s21, %s1880_s1  }
  0x58   :  { %s1889_s30 = smov [#allocation2]   ;;  %s1890_s26 = smov [#allocation7]  }
  0x59   :  { %s38_s5 = sshll.u32 %s1889_s30, 4  ;;  %s62_s13 = sshll.u32 %s1890_s26, 4  ;;  %s39_s5 = int_to_ptr.vmem [resolvable:$true] %s38_s5  ;;  %s63_s13 = int_to_ptr.vmem [resolvable:$true] %s62_s13 }
  0x5a   :  { %s1688_s22 = scalar_lea.vmem %s39_s5, 1024  ;;  %p1693_p8 = scmp.lt.s32.totalorder %s39_s5, %s39_s5 }
  0x5b   :  { %p1689_p7 = scmp.ne.s32.totalorder %s39_s5, %s1688_s22  ;;  %p1694_p9 = scmp.lt.s32.totalorder %s1688_s22, %s1688_s22 }
  0x5d   :  { %p1695_p10 = por %p1694_p9, %p1693_p8 }
  0x5f   :  { %p1696_p11 = pnand %p1695_p10, %p1689_p7 }
  0x61   :  { %1699 = shalt.err (!%p1696_p11)
}
  0x62   :  { %s2193_s24 = sld [smem:[#allocation36_spill]]  ;;  %s1708_s16 = scalar_lea.vmem %s63_s13, 1024 }
  0x63   :  { %p1709_p12 = scmp.ne.s32.totalorder %s63_s13, %s1708_s16  ;;  %p1713_p13 = scmp.lt.s32.totalorder %s63_s13, %s63_s13 }
  0x64   :  { %p1714_p0 = scmp.lt.s32.totalorder %s1708_s16, %s1708_s16 }
  0x66   :  { %p1715_p1 = por %p1714_p0, %p1713_p13 }
  0x68   :  { %44 = dma.hbm_to_vmem [thread:$0]  %s2193_s24, 1024, %s39_s5, [#allocation3], %s1883_s28, %s1883_s28, %s1884_s29  }
  0x69   :  { %p1716_p2 = pnand %p1715_p1, %p1709_p12 }
  0x6b   :  { %1719 = shalt.err (!%p1716_p2)
}
  0x6c   :  { %s2194_s27 = sld [smem:[#allocation38_spill]]  ;;  %s1891_s0 = smov [#allocation10]  }
  0x6d   :  { %s86_s20 = sshll.u32 %s1891_s0, 4  ;;  %s1892_s10 = smov [#allocation13]   ;;  %s87_s20 = int_to_ptr.vmem [resolvable:$true] %s86_s20 }
  0x6e   :  { %s111_s25 = sshll.u32 %s1892_s10, 4  ;;  %s1728_s30 = scalar_lea.vmem %s87_s20, 1024  ;;  %s112_s25 = int_to_ptr.vmem [resolvable:$true] %s111_s25 }
  0x6f   :  { %p1729_p3 = scmp.ne.s32.totalorder %s87_s20, %s1728_s30  ;;  %p1733_p4 = scmp.lt.s32.totalorder %s87_s20, %s87_s20 }
  0x70   :  { %p1734_p5 = scmp.lt.s32.totalorder %s1728_s30, %s1728_s30 }
  0x72   :  { %68 = dma.hbm_to_vmem [thread:$0]  %s2194_s27, 1024, %s63_s13, [#allocation6], %s1883_s28, %s1883_s28, %s1884_s29  }
  0x73   :  { %p1735_p6 = por %p1734_p5, %p1733_p4 }
  0x75   :  { %p1736_p7 = pnand %p1735_p6, %p1729_p3 }
  0x77   :  { %1739 = shalt.err (!%p1736_p7)
}
  0x78   :  { %92 = dma.hbm_to_vmem [thread:$0]  %s2171_s4, 1024, %s87_s20, [#allocation9], %s1879_s21, %s1879_s21, %s1880_s1  }
  0x79   :  { %s1748_s13 = scalar_lea.vmem %s112_s25, 16  ;;  %s1752_s22 = scalar_lea.vmem %s112_s25, 32 }
  0x7a   :  { %p1749_p8 = scmp.ne.s32.totalorder %s112_s25, %s1748_s13  ;;  %p1753_p9 = scmp.lt.s32.totalorder %s112_s25, %s112_s25 }
  0x7b   :  { %p1754_p10 = scmp.lt.s32.totalorder %s1752_s22, %s1748_s13 }
  0x7d   :  { %p1755_p11 = por %p1754_p10, %p1753_p9 }
  0x7f   :  { %p1756_p12 = pnand %p1755_p11, %p1749_p8 }
  0x81   :  { %1759 = shalt.err (!%p1756_p12)
}
  0x82   :  { %114 = dma.hbm_to_vmem [thread:$0]  %s2173_s6, 16, %s112_s25, [#allocation12]  }
  0x83   :  { %s1893_s24 = smov [#allocation16]   ;;  %s1894_s7 = smov [#allocation19]  }
  0x84   :  { %s132_s16 = sshll.u32 %s1893_s24, 4  ;;  %s158_s3 = sshll.u32 %s1894_s7, 4  ;;  %s133_s16 = int_to_ptr.vmem [resolvable:$true] %s132_s16  ;;  %s159_s3 = int_to_ptr.vmem [resolvable:$true] %s158_s3 }
  0x85   :  { %s1768_s27 = scalar_lea.vmem %s133_s16, 512  ;;  %p1773_p0 = scmp.lt.s32.totalorder %s133_s16, %s133_s16 }
  0x86   :  { %p1769_p13 = scmp.ne.s32.totalorder %s133_s16, %s1768_s27  ;;  %p1774_p1 = scmp.lt.s32.totalorder %s1768_s27, %s1768_s27 }
  0x88   :  { %p1775_p2 = por %p1774_p1, %p1773_p0 }
  0x8a   :  { %p1776_p3 = pnand %p1775_p2, %p1769_p13 }
  0x8c   :  { %1779 = shalt.err (!%p1776_p3)
}
  0x8d   :  { %138 = dma.hbm_to_vmem [thread:$0]  %s2175_s8, 512, %s133_s16, [#allocation15], %s1883_s28, %s1883_s28, %s1884_s29  }
  0x8e   :  { %s1788_s6 = scalar_lea.vmem %s159_s3, 1024  ;;  %p1793_p5 = scmp.lt.s32.totalorder %s159_s3, %s159_s3 }
  0x8f   :  { %p1789_p4 = scmp.ne.s32.totalorder %s159_s3, %s1788_s6  ;;  %p1794_p6 = scmp.lt.s32.totalorder %s1788_s6, %s1788_s6 }
  0x91   :  { %p1795_p7 = por %p1794_p6, %p1793_p5 }
  0x93   :  { %p1796_p8 = pnand %p1795_p7, %p1789_p4 }
  0x95   :  { %1799 = shalt.err (!%p1796_p8)
}
  0x96   :  { %164 = dma.hbm_to_vmem [thread:$0]  %s2178_s11, 1024, %s159_s3, [#allocation18], %s1879_s21, %s1879_s21, %s1880_s1  }
  0x97   :  { %s1895_s25 = smov [#allocation22]   ;;  %s1896_s5 = smov [#allocation25]  }
  0x98   :  { %s182_s30 = sshll.u32 %s1895_s25, 4  ;;  %s208_s8 = sshll.u32 %s1896_s5, 4  ;;  %s183_s30 = int_to_ptr.vmem [resolvable:$true] %s182_s30  ;;  %s209_s8 = int_to_ptr.vmem [resolvable:$true] %s208_s8 }
  0x99   :  { %s1808_s26 = scalar_lea.vmem %s183_s30, 256  ;;  %p1813_p10 = scmp.lt.s32.totalorder %s183_s30, %s183_s30 }
  0x9a   :  { %p1809_p9 = scmp.ne.s32.totalorder %s183_s30, %s1808_s26  ;;  %p1814_p11 = scmp.lt.s32.totalorder %s1808_s26, %s1808_s26 }
  0x9c   :  { %p1815_p12 = por %p1814_p11, %p1813_p10 }
  0x9e   :  { %p1816_p13 = pnand %p1815_p12, %p1809_p9 }
  0xa0   :  { %1819 = shalt.err (!%p1816_p13)
}
  0xa1   :  { %188 = dma.hbm_to_vmem [thread:$0]  %s2181_s14, 256, %s183_s30, [#allocation21], %s1883_s28, %s1883_s28, %s1884_s29  }
  0xa2   :  { %s1828_s11 = scalar_lea.vmem %s209_s8, 1024  ;;  %p1833_p1 = scmp.lt.s32.totalorder %s209_s8, %s209_s8 }
  0xa3   :  { %p1829_p0 = scmp.ne.s32.totalorder %s209_s8, %s1828_s11  ;;  %p1834_p2 = scmp.lt.s32.totalorder %s1828_s11, %s1828_s11 }
  0xa5   :  { %p1835_p3 = por %p1834_p2, %p1833_p1 }
  0xa7   :  { %p1836_p4 = pnand %p1835_p3, %p1829_p0 }
  0xa9   :  { %1839 = shalt.err (!%p1836_p4)
}
  0xaa   :  { %214 = dma.hbm_to_vmem [thread:$0]  %s2184_s17, 1024, %s209_s8, [#allocation24], %s1879_s21, %s1879_s21, %s1880_s1  }
  0xab   :  { %1860 = dma.done.wait [#allocation3], 1024  }
  0xac   :  { %1861 = vsyncadd [#allocation3], 4294966272 }
  0xad   :  { %1862 = dma.done.wait [#allocation6], 1280  }
  0xae   :  { %1863 = vsyncadd [#allocation6], 4294966016 }
  0xaf   :  { %1864 = dma.done.wait [#allocation9], 1536  }
  0xb0   :  { %1865 = vsyncadd [#allocation9], 4294965760 }
  0xb1   :  { %1866 = dma.done.wait [#allocation12], 1040  }
  0xb2   :  { %1867 = vsyncadd [#allocation12], 4294966256 }
  0xb3   :  { %1868 = dma.done.wait [#allocation15], 640  }
  0xb4   :  { %1869 = vsyncadd [#allocation15], 4294966656 }
  0xb5   :  { %1870 = dma.done.wait [#allocation18], 2048  }
  0xb6   :  { %1871 = vsyncadd [#allocation18], 4294965248 }
  0xb7   :  { %1872 = dma.done.wait [#allocation21], 320  }
  0xb8   :  { %1873 = vsyncadd [#allocation21], 4294966976 }
  0xb9   :  { %1874 = dma.done.wait [#allocation24], 2048  }
  0xba   :  { %1875 = vsyncadd [#allocation24], 4294965248  ;;  %v269_v0 = vld [vmem:[#allocation2 + $0x30] sm:$0xff]  ;;  %v270_v1 = vld [vmem:[#allocation2 + $0x38] sm:$0xff]  ;;  %vm305_vm0 = vcmask 523264   ;;  %v1897_v49 = vmov 0.0  }
  0xbb   :  { %v277_v2 = vld [vmem:[#allocation7 + $0x30] sm:$0xff]  ;;  %v278_v3 = vld [vmem:[#allocation7 + $0x38] sm:$0xff]  ;;  %v275_v8 = vld [vmem:[#allocation7 + $0x20] sm:$0xff]  ;;  %vm1898_vm1 = vmmov 0   ;;  %vm631_vm2 = vcmask 261120   ;;  %vm909_vm3 = vcmask 130048  }
  0xbc   :  { %v285_v4 = vsub.f32 %v269_v0, %v277_v2  ;;  %v267_v5 = vld [vmem:[#allocation2 + $0x20] sm:$0xff]  ;;  %v268_v6 = vld [vmem:[#allocation2 + $0x28] sm:$0xff]  ;;  %v286_v7 = vsub.f32 %v270_v1, %v278_v3  ;;  %v276_v9 = vld [vmem:[#allocation7 + $0x28] sm:$0xff]  ;;  %s1899_s7 = smov [#allocation26]  }
  0xbd   :  { %v2084_v10 = vld [vmem:[#allocation2 + $0x10] sm:$0xff]  ;;  %v283_v11 = vsub.f32 %v267_v5, %v275_v8  ;;  %v284_v12 = vsub.f32 %v268_v6, %v276_v9  ;;  %v2086_v13 = vld [vmem:[#allocation2 + $0x18] sm:$0xff]  ;;  %v273_v14 = vld [vmem:[#allocation7 + $0x10] sm:$0xff]  ;;  %s1180_s3 = sshll.u32 %s1899_s7, 4  ;;  %s1181_s3 = int_to_ptr.vmem [resolvable:$true] %s1180_s3 }
  0xbe   :  { %v274_v15 = vld [vmem:[#allocation7 + $0x18] sm:$0xff]  ;;  %v294_v16 = vpack.c.bf16 %v286_v7, %v285_v4  ;;  %v281_v17 = vsub.f32 %v2084_v10, %v273_v14  ;;  %v2090_v19 = vld [vmem:[#allocation2] sm:$0xff]  ;;  %v271_v21 = vld [vmem:[#allocation7] sm:$0xff]  ;;  %v370_v46 = vpack.c.bf16 %v2086_v13, %v2084_v10  ;;  %p1845_p6 = scmp.lt.s32.totalorder %s1181_s3, %s1181_s3 }
  0xbf   :  { %v282_v18 = vsub.f32 %v2086_v13, %v274_v15  ;;  %v2092_v20 = vld [vmem:[#allocation2 + $0x8] sm:$0xff]  ;;  %v293_v22 = vpack.c.bf16 %v284_v12, %v283_v11  ;;  %v272_v23 = vld [vmem:[#allocation7 + $0x8] sm:$0xff]  ;;  %v1489_v24 = vld [vmem:[#allocation5] sm:$0xff]   ;;  %v279_v26 = vsub.f32 %v2090_v19, %v271_v21 }
  0xc0   :  { %1321 = vmatprep.subr.bf16.mxu0 %v294_v16  ;;  %v280_v27 = vsub.f32 %v2092_v20, %v272_v23  ;;  %1329 = vmatprep.mubr.msk.bf16.mxu0 %vm305_vm0, %v1489_v24  ;;  %v1493_v28 = vld [vmem:[#allocation11 + $0x38] sm:$0xff]   ;;  %v1495_v30 = vld [vmem:[#allocation11 + $0x30] sm:$0xff]   ;;  %v1497_v31 = vld [vmem:[#allocation11 + $0x28] sm:$0xff]   ;;  %v369_v45 = vpack.c.bf16 %v2092_v20, %v2090_v19 }
  0xc1   :  { %1322 = vmatpush3.bf16.msra.mxu0 %v294_v16  ;;  %v292_v25 = vpack.c.bf16 %v282_v18, %v281_v17  ;;  %1333 = vmatprep.subr.bf16.mxu1 %v1493_v28  ;;  %v1491_v32 = vld [vmem:[#allocation10 + $0x38] sm:$0xff]   ;;  %v1499_v34 = vld [vmem:[#allocation11 + $0x20] sm:$0xff]   ;;  %v1492_v35 = vld [vmem:[#allocation10 + $0x30] sm:$0xff]  }
  0xc2   :  { %1323 = vmatprep.subr.bf16.mxu0 %v293_v22  ;;  %v291_v29 = vpack.c.bf16 %v280_v27, %v279_v26  ;;  %1334 = vmatpush3.bf16.msra.mxu1 %v1493_v28  ;;  %v1490_v33 = vld [vmem:[#allocation5 + $0x8] sm:$0xff]   ;;  %v1494_v37 = vld [vmem:[#allocation10 + $0x28] sm:$0xff]   ;;  %v1496_v38 = vld [vmem:[#allocation10 + $0x20] sm:$0xff]  }
  0xc3   :  { %1335 = vmatprep.subr.bf16.mxu1 %v1495_v30  ;;  %v1501_v36 = vld [vmem:[#allocation11 + $0x18] sm:$0xff]   ;;  %v1500_v40 = vld [vmem:[#allocation10 + $0x10] sm:$0xff]   ;;  %v1502_v41 = vld [vmem:[#allocation10 + $0x8] sm:$0xff]  }
  0xc4   :  { %v1498_v39 = vld [vmem:[#allocation10 + $0x18] sm:$0xff]   ;;  %v1503_v42 = vld [vmem:[#allocation11 + $0x10] sm:$0xff]   ;;  %v1504_v43 = vld [vmem:[#allocation10] sm:$0xff]  }
  0xc5   :  { %1324 = vmatpush3.bf16.msra.mxu0 %v293_v22  ;;  %v1505_v44 = vld [vmem:[#allocation11 + $0x8] sm:$0xff]   ;;  %v1506_v47 = vld [vmem:[#allocation11] sm:$0xff]   ;;  %v1509_v51 = vld [vmem:[#allocation17 + $0x28] sm:$0xff]  }
  0xc6   :  { %1325 = vmatprep.subr.bf16.mxu0 %v292_v25  ;;  %1336 = vmatpush3.bf16.msra.mxu1 %v1495_v30  ;;  %v1507_v48 = vld [vmem:[#allocation17 + $0x38] sm:$0xff]   ;;  %v1508_v50 = vld [vmem:[#allocation17 + $0x30] sm:$0xff]   ;;  %v1510_v52 = vld [vmem:[#allocation17 + $0x20] sm:$0xff]  }
  0xc7   :  { %1337 = vmatprep.subr.bf16.mxu1 %v1497_v31  ;;  %v364_v55 = vld [vmem:[#allocation8 + $0x18] sm:$0xff]  ;;  %v361_v56 = vld [vmem:[#allocation8] sm:$0xff]  ;;  %v362_v58 = vld [vmem:[#allocation8 + $0x8] sm:$0xff] }
  0xc8   :  { %v363_v59 = vld [vmem:[#allocation8 + $0x10] sm:$0xff]  ;;  %v1511_v3 = vld [vmem:[#allocation17 + $0x18] sm:$0xff]   ;;  %v1512_v4 = vld [vmem:[#allocation17 + $0x10] sm:$0xff]  }
  0xc9   :  { %1326 = vmatpush3.bf16.msra.mxu0 %v292_v25  ;;  %v1513_v5 = vld [vmem:[#allocation17 + $0x8] sm:$0xff]   ;;  %v1514_v6 = vld [vmem:[#allocation17] sm:$0xff]   ;;  %v1216_v10 = vld [vmem:[#allocation13] ss:$0 sm:$0xff] }
  0xca   :  { %1327 = vmatprep.subr.bf16.mxu0 %v291_v29  ;;  %1338 = vmatpush3.bf16.msra.mxu1 %v1497_v31  ;;  %v616_v24 = vld [vmem:[#allocation16 + $0x10] sm:$0xff]  ;;  %v617_v25 = vld [vmem:[#allocation16 + $0x18] sm:$0xff]  ;;  %v615_v28 = vld [vmem:[#allocation16 + $0x8] sm:$0xff] }
  0xcb   :  { %1339 = vmatprep.subr.bf16.mxu1 %v1499_v34 }
  0xcd   :  { %1328 = vmatpush3.bf16.msra.mxu0 %v291_v29 }
  0xce   :  { %1353 = vmatprep.subr.bf16.mxu0 %v1491_v32  ;;  %1340 = vmatpush3.bf16.msra.mxu1 %v1499_v34 }
  0xcf   :  { %1341 = vmatprep.subr.bf16.mxu1 %v1501_v36 }
  0xd0   :  { %1330 = vmatmul.mubr.msk.bf16.vlgmr.msra.gmra.mxu0 %vm305_vm0, %v1490_v33  ;;  %v614_v33 = vld [vmem:[#allocation16] sm:$0xff] }
  0xd1   :  { %1354 = vmatpush3.bf16.msra.mxu0 %v1491_v32  ;;  %1369 = vmatprep.mubr.bf16.mxu0 %v369_v45  ;;  %v1521_v45 = vld [vmem:[#allocation19 + $0x10] sm:$0xff]  }
  0xd2   :  { %1355 = vmatprep.subr.bf16.mxu0 %v1492_v35  ;;  %1342 = vmatpush3.bf16.msra.mxu1 %v1501_v36 }
  0xd3   :  { %1343 = vmatprep.subr.bf16.mxu1 %v1503_v42 }
  0xd5   :  { %1356 = vmatpush3.bf16.msra.mxu0 %v1492_v35 }
  0xd6   :  { %1357 = vmatprep.subr.bf16.mxu0 %v1494_v37  ;;  %1344 = vmatpush3.bf16.msra.mxu1 %v1503_v42  ;;  %v1518_v42 = vld [vmem:[#allocation19 + $0x28] sm:$0xff]  }
  0xd7   :  { %1345 = vmatprep.subr.bf16.mxu1 %v1505_v44 }
  0xd9   :  { %1358 = vmatpush3.bf16.msra.mxu0 %v1494_v37 }
  0xda   :  { %1359 = vmatprep.subr.bf16.mxu0 %v1496_v38  ;;  %1346 = vmatpush3.bf16.msra.mxu1 %v1505_v44  ;;  %v1520_v44 = vld [vmem:[#allocation19 + $0x18] sm:$0xff]  }
  0xdb   :  { %1347 = vmatprep.subr.bf16.mxu1 %v1506_v47 }
  0xdd   :  { %1360 = vmatpush3.bf16.msra.mxu0 %v1496_v38 }
  0xde   :  { %1361 = vmatprep.subr.bf16.mxu0 %v1498_v39  ;;  %1348 = vmatpush3.bf16.msra.mxu1 %v1506_v47  ;;  %v1523_v47 = vld [vmem:[#allocation19] sm:$0xff]  }
  0xdf   :  { %1373 = vmatprep.subr.bf16.mxu1 %v1897_v49 }
  0xe1   :  { %1362 = vmatpush3.bf16.msra.mxu0 %v1498_v39  ;;  %v1515_v39 = vld [vmem:[#allocation14] sm:$0xff]  }
  0xe2   :  { %1363 = vmatprep.subr.bf16.mxu0 %v1500_v40 }
  0xe5   :  { %1364 = vmatpush3.bf16.msra.mxu0 %v1500_v40  ;;  %v1516_v40 = vld [vmem:[#allocation19 + $0x38] sm:$0xff]  }
  0xe6   :  { %1365 = vmatprep.subr.bf16.mxu0 %v1502_v41 }
  0xe9   :  { %1366 = vmatpush3.bf16.msra.mxu0 %v1502_v41  ;;  %v1517_v41 = vld [vmem:[#allocation19 + $0x30] sm:$0xff]  }
  0xea   :  { %1367 = vmatprep.subr.bf16.mxu0 %v1504_v43 }
  0xed   :  { %1368 = vmatpush3.bf16.msra.mxu0 %v1504_v43  ;;  %v1519_v43 = vld [vmem:[#allocation19 + $0x20] sm:$0xff]  }
  0xee   :  { %1401 = vmatprep.subr.bf16.mxu0 %v1897_v49 }
  0xf0   :  { %1370 = vmatmul.mubr.bf16.vlgmr.msra.gmra.mxu0 %v370_v46  ;;  %v1522_v46 = vld [vmem:[#allocation19 + $0x8] sm:$0xff]  }
  0xf1   :  { %1402 = vmatpush3.bf16.msra.mxu0 %v1507_v48  ;;  %1417 = vmatprep.mubr.msk.bf16.mxu0 %vm1898_vm1, %v1897_v49 }
  0xf2   :  { %1403 = vmatprep.subr.bf16.mxu0 %v1897_v49 }
  0xf5   :  { %1404 = vmatpush3.bf16.msra.mxu0 %v1508_v50 }
  0xf6   :  { %1405 = vmatprep.subr.bf16.mxu0 %v1897_v49 }
  0xf9   :  { %1406 = vmatpush3.bf16.msra.mxu0 %v1509_v51 }
  0xfa   :  { %1407 = vmatprep.subr.bf16.mxu0 %v1897_v49 }
  0xfd   :  { %1408 = vmatpush3.bf16.msra.mxu0 %v1510_v52 }
  0xfe   :  { %1409 = vmatprep.subr.bf16.mxu0 %v1897_v49 }
 0x101   :  { %1410 = vmatpush3.bf16.msra.mxu0 %v1511_v3  ;;  %v1537_v3 = vld [vmem:[#allocation25 + $0x10] sm:$0xff]  }
 0x102   :  { %1411 = vmatprep.subr.bf16.mxu0 %v1897_v49 }
 0x105   :  { %1412 = vmatpush3.bf16.msra.mxu0 %v1512_v4  ;;  %v1538_v4 = vld [vmem:[#allocation25 + $0x8] sm:$0xff]  }
 0x106   :  { %1413 = vmatprep.subr.bf16.mxu0 %v1897_v49 }
 0x109   :  { %1414 = vmatpush3.bf16.msra.mxu0 %v1513_v5 }
 0x10a   :  { %1415 = vmatprep.subr.bf16.mxu0 %v1897_v49 }
 0x10d   :  { %1416 = vmatpush3.bf16.msra.mxu0 %v1514_v6  ;;  %v1235_v6 = vld [vmem:[%s2179_s12] ss:$0 sm:$0xff] }
 0x10e   :  { %1427 = vmatprep.subr.bf16.mxu0 %v1897_v49 }
 0x190   :  { %v1331_v53 = vpop.f32.mrf.mxu0 }
 0x191   :  { %v367_v0 = vadd.f32 %v1331_v53, %v363_v59 }
 0x192   :  { %v346_v54 = vpop.f32.mrf.mxu0 }
 0x193   :  { %v365_v62 = vadd.f32 %v361_v56, %v346_v54  ;;  %v676_v54 = vld [vmem:[%s2176_s9] sm:$0xff]  ;;  %v677_v56 = vld [vmem:[%s2176_s9 + $0x8] sm:$0xff] }
 0x194   :  { %v1332_v57 = vpop.f32.mrf.mxu0 }
 0x195   :  { %v368_v60 = vadd.f32 %v1332_v57, %v364_v55 }
 0x196   :  { %v349_v61 = vpop.f32.mrf.mxu0 }
 0x197   :  { %v366_v63 = vadd.f32 %v362_v58, %v349_v61  ;;  %v388_v2 = vpack.c.bf16 %v368_v60, %v367_v0  ;;  %v1534_v0 = vld [vmem:[#allocation25 + $0x28] sm:$0xff]  }
 0x199   :  { %v387_v1 = vpack.c.bf16 %v366_v63, %v365_v62  ;;  %v1532_v62 = vld [vmem:[#allocation25 + $0x38] sm:$0xff]   ;;  %v1533_v63 = vld [vmem:[#allocation25 + $0x30] sm:$0xff]  }
 0x19b   :  { %1349 = vmatprep.mubr.bf16.mxu1 %v387_v1  ;;  %v1535_v1 = vld [vmem:[#allocation25 + $0x20] sm:$0xff]  }
 0x19c   :  { %1350 = vmatmul.mubr.bf16.vlgmr.msra.gmra.mxu1 %v388_v2  ;;  %v1536_v2 = vld [vmem:[#allocation25 + $0x18] sm:$0xff]  }
 0x19d   :  { %1377 = vmatprep.mubr.msk.bf16.mxu1 %vm1898_vm1, %v1897_v49 }
 0x1b0   :  { %v1371_v7 = vpop.f32.mrf.mxu0 }
 0x1b2   :  { %v584_v8 = vpop.f32.mrf.mxu0 }
 0x1b4   :  { %v1372_v12 = vpop.f32.mrf.mxu0 }
 0x1b6   :  { %v587_v18 = vpop.f32.mrf.mxu0 }
 0x25c   :  { %v1351_v9 = vpop.f32.mrf.mxu1 }
 0x25d   :  { %v593_v11 = vadd.f32 %v1371_v7, %v1351_v9 }
 0x25e   :  { %v487_v13 = vpop.f32.mrf.mxu1 }
 0x25f   :  { %v608_v14 = vadd.f32 %v1216_v10, %v593_v11  ;;  %v585_v15 = vadd.f32 %v584_v8, %v487_v13 }
 0x260   :  { %v1352_v16 = vpop.f32.mrf.mxu1 }
 0x261   :  { %v596_v17 = vadd.f32 %v1372_v12, %v1352_v16  ;;  %v612_v20 = vmax.f32 %v608_v14, 0.0  ;;  %v606_v21 = vadd.f32 %v1216_v10, %v585_v15  ;;  %v903_v15 = vld [vmem:[#allocation22] sm:$0xff]  ;;  %v904_v16 = vld [vmem:[#allocation22 + $0x8] sm:$0xff] }
 0x262   :  { %v490_v19 = vpop.f32.mrf.mxu1 }
 0x263   :  { %v609_v22 = vadd.f32 %v1216_v10, %v596_v17  ;;  %v588_v23 = vadd.f32 %v587_v18, %v490_v19  ;;  %v620_v29 = vsub.f32 %v612_v20, %v616_v24  ;;  %v610_v30 = vmax.f32 %v606_v21, 0.0  ;;  %v907_v21 = vld [vmem:[#allocation20] sm:$0xf] }
 0x264   :  { %v1526_v24 = vld [vmem:[#allocation23 + $0x28] sm:$0xff]  }
 0x265   :  { %v613_v26 = vmax.f32 %v609_v22, 0.0  ;;  %v607_v27 = vadd.f32 %v1216_v10, %v588_v23  ;;  %v618_v37 = vsub.f32 %v610_v30, %v614_v33  ;;  %v1524_v22 = vld [vmem:[#allocation23 + $0x38] sm:$0xff]   ;;  %v1525_v23 = vld [vmem:[#allocation23 + $0x30] sm:$0xff]  }
 0x267   :  { %v621_v31 = vsub.f32 %v613_v26, %v617_v25  ;;  %v611_v32 = vmax.f32 %v607_v27, 0.0  ;;  %v1527_v25 = vld [vmem:[#allocation23 + $0x20] sm:$0xff]   ;;  %v1528_v26 = vld [vmem:[#allocation23 + $0x18] sm:$0xff]   ;;  %v1529_v27 = vld [vmem:[#allocation23 + $0x10] sm:$0xff]  }
 0x269   :  { %v625_v34 = vpack.c.bf16 %v621_v31, %v620_v29  ;;  %v619_v35 = vsub.f32 %v611_v32, %v615_v28  ;;  %v680_v36 = vpack.c.bf16 %v611_v32, %v610_v30  ;;  %v1530_v28 = vld [vmem:[#allocation23 + $0x8] sm:$0xff]   ;;  %v1531_v29 = vld [vmem:[#allocation23] sm:$0xff]   ;;  %v953_v32 = vld [vmem:[%s2182_s15] sm:$0xff]  ;;  %s1840_s15 = scalar_lea.vmem %s1181_s3, 128 }
 0x26a   :  { %v1539_v31 = vld [vmem:[#allocation25] sm:$0xff]   ;;  %p1841_p5 = scmp.ne.s32.totalorder %s1181_s3, %s1840_s15  ;;  %p1846_p7 = scmp.lt.s32.totalorder %s1840_s15, %s1840_s15 }
 0x26b   :  { %1374 = vmatpush3.bf16.msra.mxu1 %v625_v34  ;;  %1418 = vmatmul.mubr.bf16.vlgmr.msra.gmra.mxu0 %v680_v36  ;;  %v624_v38 = vpack.c.bf16 %v619_v35, %v618_v37 }
 0x26c   :  { %1375 = vmatprep.subr.bf16.mxu1 %v1897_v49  ;;  %1443 = vmatprep.mubr.msk.bf16.mxu0 %vm1898_vm1, %v1897_v49  ;;  %p1847_p8 = por %p1846_p7, %p1845_p6 }
 0x26d   :  { %1428 = vmatpush3.bf16.msra.mxu0 %v1532_v62 }
 0x26e   :  { %1429 = vmatprep.subr.bf16.mxu0 %v1897_v49  ;;  %p1848_p9 = pnand %p1847_p8, %p1841_p5 }
 0x26f   :  { %1376 = vmatpush3.bf16.msra.mxu1 %v624_v38 }
 0x270   :  { %1381 = vmatprep.subr.bf16.mxu1 %v1897_v49 }
 0x271   :  { %1430 = vmatpush3.bf16.msra.mxu0 %v1533_v63 }
 0x272   :  { %1378 = vmatmul.mubr.msk.bf16.vlgmr.msra.gmra.mxu1 %vm631_vm2, %v1515_v39  ;;  %1431 = vmatprep.subr.bf16.mxu0 %v1897_v49 }
 0x273   :  { %1382 = vmatpush3.bf16.msra.mxu1 %v1516_v40  ;;  %1397 = vmatprep.mubr.msk.bf16.mxu1 %vm1898_vm1, %v1897_v49 }
 0x274   :  { %1383 = vmatprep.subr.bf16.mxu1 %v1897_v49 }
 0x275   :  { %1432 = vmatpush3.bf16.msra.mxu0 %v1534_v0 }
 0x276   :  { %1433 = vmatprep.subr.bf16.mxu0 %v1897_v49 }
 0x277   :  { %1384 = vmatpush3.bf16.msra.mxu1 %v1517_v41 }
 0x278   :  { %1385 = vmatprep.subr.bf16.mxu1 %v1897_v49 }
 0x279   :  { %1434 = vmatpush3.bf16.msra.mxu0 %v1535_v1 }
 0x27a   :  { %1435 = vmatprep.subr.bf16.mxu0 %v1897_v49 }
 0x27b   :  { %1386 = vmatpush3.bf16.msra.mxu1 %v1518_v42 }
 0x27c   :  { %1387 = vmatprep.subr.bf16.mxu1 %v1897_v49 }
 0x27d   :  { %1436 = vmatpush3.bf16.msra.mxu0 %v1536_v2 }
 0x27e   :  { %1437 = vmatprep.subr.bf16.mxu0 %v1897_v49 }
 0x27f   :  { %1388 = vmatpush3.bf16.msra.mxu1 %v1519_v43  ;;  %v1253_v43 = vld [vmem:[%s2185_s18] ss:$0 sm:$0xff] }
 0x280   :  { %1389 = vmatprep.subr.bf16.mxu1 %v1897_v49 }
 0x281   :  { %1438 = vmatpush3.bf16.msra.mxu0 %v1537_v3 }
 0x282   :  { %1439 = vmatprep.subr.bf16.mxu0 %v1897_v49 }
 0x283   :  { %1390 = vmatpush3.bf16.msra.mxu1 %v1520_v44 }
 0x284   :  { %1391 = vmatprep.subr.bf16.mxu1 %v1897_v49 }
 0x285   :  { %1440 = vmatpush3.bf16.msra.mxu0 %v1538_v4 }
 0x286   :  { %1441 = vmatprep.subr.bf16.mxu0 %v1897_v49 }
 0x287   :  { %1392 = vmatpush3.bf16.msra.mxu1 %v1521_v45 }
 0x288   :  { %1393 = vmatprep.subr.bf16.mxu1 %v1897_v49 }
 0x289   :  { %1442 = vmatpush3.bf16.msra.mxu0 %v1539_v31 }
 0x28b   :  { %1394 = vmatpush3.bf16.msra.mxu1 %v1522_v46 }
 0x28c   :  { %1395 = vmatprep.subr.bf16.mxu1 %v1897_v49 }
 0x28f   :  { %1396 = vmatpush3.bf16.msra.mxu1 %v1523_v47 }
 0x290   :  { %1421 = vmatprep.subr.bf16.mxu1 %v1897_v49 }
 0x32b   :  { %v885_v48 = vpop.f32.mrf.mxu0 }
 0x32d   :  { %v1419_v50 = vpop.f32.mrf.mxu0 }
 0x32f   :  { %v888_v51 = vpop.f32.mrf.mxu0 }
 0x331   :  { %v1420_v52 = vpop.f32.mrf.mxu0 }
 0x332   :  { %v669_v53 = vpop.f32.mrf.mxu1 }
 0x333   :  { %v678_v58 = vadd.f32 %v676_v54, %v669_v53 }
 0x334   :  { %v1379_v55 = vpop.f32.mrf.mxu1 }
 0x336   :  { %v672_v57 = vpop.f32.mrf.mxu1 }
 0x337   :  { %v679_v59 = vadd.f32 %v677_v56, %v672_v57 }
 0x338   :  { %v1380_v60 = vpop.f32.mrf.mxu1 }
 0x339   :  { %v697_v61 = vpack.c.bf16 %v679_v59, %v678_v58 }
 0x33b   :  { %1398 = vmatmul.mubr.bf16.vlgmr.msra.gmra.mxu1 %v697_v61 }
 0x33c   :  { %1423 = vmatprep.mubr.msk.bf16.mxu1 %vm1898_vm1, %v1897_v49 }
 0x3fb   :  { %v796_v5 = vpop.f32.mrf.mxu1 }
 0x3fc   :  { %v886_v7 = vadd.f32 %v885_v48, %v796_v5 }
 0x3fd   :  { %v1399_v8 = vpop.f32.mrf.mxu1 }
 0x3fe   :  { %v899_v9 = vadd.f32 %v1235_v6, %v886_v7 }
 0x3ff   :  { %v799_v10 = vpop.f32.mrf.mxu1 }
 0x400   :  { %v889_v11 = vadd.f32 %v888_v51, %v799_v10  ;;  %v901_v13 = vmax.f32 %v899_v9, 0.0 }
 0x401   :  { %v1400_v12 = vpop.f32.mrf.mxu1 }
 0x402   :  { %v900_v14 = vadd.f32 %v1235_v6, %v889_v11  ;;  %v905_v18 = vsub.f32 %v901_v13, %v903_v15  ;;  %v955_v30 = vpack.c.bf16 %v901_v13, %v901_v13 }
 0x404   :  { %v902_v17 = vmax.f32 %v900_v14, 0.0 }
 0x406   :  { %v906_v19 = vsub.f32 %v902_v17, %v904_v16 }
 0x408   :  { %v908_v20 = vpack.c.bf16 %v906_v19, %v905_v18 }
 0x40a   :  { %1422 = vmatpush3.bf16.msra.mxu1 %v908_v20 }
 0x40b   :  { %1447 = vmatprep.subr.bf16.mxu1 %v1897_v49 }
 0x40d   :  { %1424 = vmatmul.mubr.msk.bf16.vlgmr.msra.gmra.mxu1 %vm909_vm3, %v907_v21 }
 0x40e   :  { %1448 = vmatpush3.bf16.msra.mxu1 %v1524_v22  ;;  %1463 = vmatprep.mubr.msk.bf16.mxu1 %vm1898_vm1, %v1897_v49 }
 0x40f   :  { %1449 = vmatprep.subr.bf16.mxu1 %v1897_v49 }
 0x412   :  { %1450 = vmatpush3.bf16.msra.mxu1 %v1525_v23 }
 0x413   :  { %1451 = vmatprep.subr.bf16.mxu1 %v1897_v49 }
 0x416   :  { %1452 = vmatpush3.bf16.msra.mxu1 %v1526_v24 }
 0x417   :  { %1453 = vmatprep.subr.bf16.mxu1 %v1897_v49 }
 0x41a   :  { %1454 = vmatpush3.bf16.msra.mxu1 %v1527_v25 }
 0x41b   :  { %1455 = vmatprep.subr.bf16.mxu1 %v1897_v49 }
 0x41e   :  { %1456 = vmatpush3.bf16.msra.mxu1 %v1528_v26 }
 0x41f   :  { %1457 = vmatprep.subr.bf16.mxu1 %v1897_v49 }
 0x422   :  { %1458 = vmatpush3.bf16.msra.mxu1 %v1529_v27 }
 0x423   :  { %1459 = vmatprep.subr.bf16.mxu1 %v1897_v49 }
 0x426   :  { %1460 = vmatpush3.bf16.msra.mxu1 %v1530_v28 }
 0x427   :  { %1461 = vmatprep.subr.bf16.mxu1 %v1897_v49 }
 0x42a   :  { %1462 = vmatpush3.bf16.msra.mxu1 %v1531_v29 }
 0x42d   :  { %1464 = vmatmul.mubr.bf16.vlgmr.msra.gmra.mxu1 %v955_v30 }
 0x4cd   :  { %v947_v33 = vpop.f32.mrf.mxu1 }
 0x4ce   :  { %v954_v34 = vadd.f32 %v953_v32, %v947_v33 }
 0x4cf   :  { %v1425_v35 = vpop.f32.mrf.mxu1 }
 0x4d0   :  { %v972_v36 = vpack.c.bf16 %v954_v34, %v954_v34 }
 0x4d1   :  { %v950_v37 = vpop.f32.mrf.mxu1 }
 0x4d2   :  { %1444 = vmatmul.mubr.bf16.vlgmr.msra.gmra.mxu0 %v972_v36 }
 0x4d3   :  { %v1426_v38 = vpop.f32.mrf.mxu1 }
 0x4ed   :  { %v1159_v39 = vpop.f32.mrf.mxu1 }
 0x4ef   :  { %v1465_v40 = vpop.f32.mrf.mxu1 }
 0x4f1   :  { %v1162_v41 = vpop.f32.mrf.mxu1 }
 0x4f3   :  { %v1466_v49 = vpop.f32.mrf.mxu1 }
 0x592   :  { %v1071_v42 = vpop.f32.mrf.mxu0 }
 0x593   :  { %v1160_v44 = vadd.f32 %v1159_v39, %v1071_v42 }
 0x594   :  { %v1445_v45 = vpop.f32.mrf.mxu0 }
 0x595   :  { %v1172_v46 = vadd.f32 %v1253_v43, %v1160_v44 }
 0x596   :  { %v1074_v47 = vpop.f32.mrf.mxu0 }
 0x597   :  { %1173 = vst [vmem:[#allocation26] sm:$0xff] %v1172_v46 }
 0x598   :  { %v1446_v48 = vpop.f32.mrf.mxu0 }
 0x599   :  { %1851 = shalt.err (!%p1848_p9)
}
 0x59a   :  { %1183 = dma.vmem_to_hbm [thread:$0]  %s1181_s3, 128, %s2186_s19, [#allocation4]  }
 0x59b   :  { %1876 = dma.done.wait [#allocation4], 128  }
 0x59c   :  { %1877 = vsyncadd [#allocation4], 4294967168 }
 0x59d   :  { %1187 = vsyncpa [#allocation3], 1 }
 0x59e   :  { %1188 = vsyncpa [#allocation6], 1 }
 0x59f   :  { %1189 = vsyncpa [#allocation9], 1 }
 0x5a0   :  { %1190 = vsyncpa [#allocation12], 1 }
 0x5a1   :  { %1191 = vsyncpa [#allocation15], 1 }
 0x5a2   :  { %1192 = vsyncpa [#allocation18], 1 }
 0x5a3   :  { %1193 = vsyncpa [#allocation21], 1 }
 0x5a4   :  { %1194 = vsyncpa [#allocation24], 1 }
 0x5a5   :  { %1195 = vsyncpa [#allocation4], 1 }

</bundles_post_ra>
